<compile_context>
chip_gen: v6e
topology: v6e:2x2x1
jax: 0.10.0
libtpu: 0.0.40
codegen_flags: <defaults>
</compile_context>

<pallas_src>
import jax
import jax.numpy as jnp
from jax.experimental import pallas as pl
from jax.experimental.pallas import tpu as pltpu

EPS = 1e-5


# ---------------------------------------------------------------------------
# Kernels
# ---------------------------------------------------------------------------
def _ln_withbias_kernel(x_ref, w_ref, b_ref, o_ref):
    # x_ref: (1, C, T) -- C on sublanes, spatial T on lanes (lane-dense I/O)
    x = x_ref[...].astype(jnp.float32)
    w = w_ref[...].astype(jnp.float32)
    b = b_ref[...].astype(jnp.float32)

    mu = jnp.mean(x, axis=1, keepdims=True)            # cross-sublane reduce (XLU)
    xc = x - mu
    var = jnp.mean(xc * xc, axis=1, keepdims=True)     # unbiased=False
    inv = jax.lax.rsqrt(var + EPS)

    o_ref[...] = (xc * inv * w + b).astype(o_ref.dtype)


def _ln_biasfree_kernel(x_ref, w_ref, o_ref):
    x = x_ref[...].astype(jnp.float32)
    w = w_ref[...].astype(jnp.float32)

    mu = jnp.mean(x, axis=1, keepdims=True)
    ex2 = jnp.mean(x * x, axis=1, keepdims=True)
    # E[x^2] - mu^2 avoids materializing the centered temp (capacity win).
    # Clamp to 0 so stale OOB lanes of a boundary block can't produce NaN.
    var = jnp.maximum(ex2 - mu * mu, 0.0)
    inv = jax.lax.rsqrt(var + EPS)

    o_ref[...] = (x * inv * w).astype(o_ref.dtype)     # mean only inside var


# ---------------------------------------------------------------------------
# Tiling heuristics (generation-aware)
# ---------------------------------------------------------------------------
def _tpu_budgets():
    """(max bytes per input tile, vmem_limit_bytes) for the current chip."""
    vmem_cap = None
    try:
        vmem_cap = pltpu.get_tpu_info().vmem_capacity_bytes
    except Exception:
        vmem_cap = None
    if vmem_cap is None:
        vmem_cap = 64 * 1024 * 1024                  # conservative (v7x-sized)
    if vmem_cap >= 128 * 1024 * 1024:                # v5e / v6e
        return 8 * 1024 * 1024, 96 * 1024 * 1024
    return 4 * 1024 * 1024, 48 * 1024 * 1024         # v7x (64 MiB physical)


def _choose_tile_hw(hw, c, itemsize, max_block_bytes, batch, max_tile_hw=None):
    """Largest lane-dense spatial tile that keeps the block within budget."""
    max_hw = max(128, max_block_bytes // max(1, c * itemsize))
    if max_tile_hw is not None:
        max_hw = min(max_hw, max(128, max_tile_hw))
    if hw <= max_hw:
        # Normally take the full extent (no (8,128) constraint then), but if
        # the whole grid would collapse to a single point, split the spatial
        # axis so both v7x TensorCores get work.
        if batch == 1 and hw >= 256:
            half = pl.cdiv(hw, 2)
            return ((half + 127) // 128) * 128
        return hw
    return max(128, (max_hw // 128) * 128)


# ---------------------------------------------------------------------------
# Wrapper
# ---------------------------------------------------------------------------
def layer_norm(x_nchw, weight, bias=None, layer_norm_type="WithBias",
               max_tile_hw=None):
    """Matches LayerNorm(dim, LayerNorm_type).forward on NCHW input."""
    b, c, h, w = x_nchw.shape
    hw = h * w
    x3 = x_nchw.reshape(b, c, hw)                    # free reshape, NCHW kept

    max_block_bytes, vmem_limit = _tpu_budgets()
    tile_hw = _choose_tile_hw(hw, c, x_nchw.dtype.itemsize,
                              max_block_bytes, b, max_tile_hw)
    n_tiles = pl.cdiv(hw, tile_hw)                   # ragged handled by Pallas

    w3 = jnp.asarray(weight).reshape(1, c, 1)
    bias_free = (layer_norm_type == "BiasFree")

    x_spec = pl.BlockSpec((1, c, tile_hw), lambda i, j: (i, 0, j))
    p_spec = pl.BlockSpec((1, c, 1), lambda i, j: (0, 0, 0))
    out_spec = pl.BlockSpec((1, c, tile_hw), lambda i, j: (i, 0, j))

    if bias_free:
        kernel = _ln_biasfree_kernel
        in_specs = [x_spec, p_spec]
        args = (x3, w3)
    else:
        kernel = _ln_withbias_kernel
        in_specs = [x_spec, p_spec, p_spec]
        b3 = jnp.asarray(bias).reshape(1, c, 1)
        args = (x3, w3, b3)

    y3 = pl.pallas_call(
        kernel,
        out_shape=jax.ShapeDtypeStruct((b, c, hw), x_nchw.dtype),
        grid_spec=pltpu.PrefetchScalarGridSpec(
            num_scalar_prefetch=0,
            grid=(b, n_tiles),
            in_specs=in_specs,
            out_specs=out_spec,
        ),
        compiler_params=pltpu.CompilerParams(
            dimension_semantics=("parallel", "parallel"),
            vmem_limit_bytes=int(vmem_limit)),
    )(*args)

    return y3.reshape(b, c, h, w)


# ---------------------------------------------------------------------------
# Pure-JAX reference + self-test
# ---------------------------------------------------------------------------
def _ref_layer_norm(x_nchw, weight, bias, layer_norm_type):
    b, c, h, w = x_nchw.shape
    x3 = jnp.transpose(x_nchw, (0, 2, 3, 1)).reshape(b, h * w, c).astype(jnp.float32)
    mu = jnp.mean(x3, axis=-1, keepdims=True)
    var = jnp.mean((x3 - mu) ** 2, axis=-1, keepdims=True)
    if layer_norm_type == "BiasFree":
        y = x3 / jnp.sqrt(var + EPS) * weight
    else:
        y = (x3 - mu) / jnp.sqrt(var + EPS) * weight + bias
    y = y.astype(x_nchw.dtype)
    return jnp.transpose(y.reshape(b, h, w, c), (0, 3, 1, 2))


if __name__ == "__main__":
    key = jax.random.PRNGKey(0)
    ok = True

    # Case 1: module's natural small config (C=4), ones/zeros params, B=2.
    B, C, H, W = 2, 4, 16, 16
    k0, k1, k2 = jax.random.split(key, 3)
    x = jax.random.normal(k0, (B, C, H, W), dtype=jnp.float32)
    weight = jnp.ones((C,), dtype=jnp.float32)
    bias = jnp.zeros((C,), dtype=jnp.float32)
    for ln_type in ("WithBias", "BiasFree"):
        out = jax.block_until_ready(layer_norm(x, weight, bias, ln_type))
        ref = _ref_layer_norm(x, weight, bias, ln_type)
        ok &= bool(jnp.allclose(out, ref, atol=1e-5, rtol=1e-5))
        ok &= (out.shape == (B, C, H, W))

    # Case 2: C multiple of 128, non-divisible token count, forced small tile
    # -> exercises the masked ragged boundary block (no wrapper pad/slice).
    B2, C2, H2, W2 = 1, 128, 16, 13              # H*W = 208 -> tiles 128 + 80
    x2 = jax.random.normal(k1, (B2, C2, H2, W2), dtype=jnp.float32)
    w2 = jax.random.normal(k2, (C2,), dtype=jnp.float32)
    b2 = jax.random.normal(k0, (C2,), dtype=jnp.float32)
    for ln_type in ("WithBias", "BiasFree"):
        out2 = jax.block_until_ready(
            layer_norm(x2, w2, b2, ln_type, max_tile_hw=128))
        ref2 = _ref_layer_norm(x2, w2, b2, ln_type)
        ok &= bool(jnp.allclose(out2, ref2, atol=1e-4, rtol=1e-4))
        ok &= (out2.shape == (B2, C2, H2, W2))

    # Case 3: batch=1, single-tile-sized spatial extent -> the wrapper splits
    # the spatial axis into 2 tiles (v7x dual-TensorCore path).
    B3, C3, H3, W3 = 1, 4, 16, 16                # H*W = 256 -> 2 tiles of 128
    x3_in = jax.random.normal(k2, (B3, C3, H3, W3), dtype=jnp.float32)
    w3_ = jax.random.normal(k1, (C3,), dtype=jnp.float32)
    b3_ = jax.random.normal(k0, (C3,), dtype=jnp.float32)
    for ln_type in ("WithBias", "BiasFree"):
        out3 = jax.block_until_ready(layer_norm(x3_in, w3_, b3_, ln_type))
        ref3 = _ref_layer_norm(x3_in, w3_, b3_, ln_type)
        ok &= bool(jnp.allclose(out3, ref3, atol=1e-5, rtol=1e-5))
        ok &= (out3.shape == (B3, C3, H3, W3))

    print("KERNEL_OK" if ok else "KERNEL_MISMATCH")
</pallas_src>

<mosaic_0001>
module attributes {stable_mosaic.version = 11 : i64} {
  func.func @_ln_withbias_kernel(%arg0: i32, %arg1: i32, %arg2: memref<1x4x256xf32, #tpu.memory_space<vmem>>, %arg3: memref<1x4x1xf32, #tpu.memory_space<vmem>>, %arg4: memref<1x4x1xf32, #tpu.memory_space<vmem>>, %arg5: memref<1x4x256xf32, #tpu.memory_space<vmem>>) attributes {dimension_semantics = [#tpu.dimension_semantics<parallel>, #tpu.dimension_semantics<parallel>], iteration_bounds = array<i64: 2, 1>, scalar_prefetch = 0 : i64, scratch_operands = 0 : i64, tpu.core_type = #tpu.core_type<tc>, window_params = [{transform_indices = @transform_0, window_bounds = array<i64: 1, 4, 256>}, {pipeline_mode = #tpu.pipeline_mode<synchronous>, transform_indices = @transform_1, window_bounds = array<i64: 1, 4, 1>}, {pipeline_mode = #tpu.pipeline_mode<synchronous>, transform_indices = @transform_2, window_bounds = array<i64: 1, 4, 1>}, {transform_indices = @transform_3, window_bounds = array<i64: 1, 4, 256>}]} {
    %c0 = arith.constant 0 : index
    %c0_0 = arith.constant 0 : index
    %c0_1 = arith.constant 0 : index
    %0 = vector.load %arg2[%c0, %c0_0, %c0_1] : memref<1x4x256xf32, #tpu.memory_space<vmem>>, vector<1x4x256xf32>
    %c0_2 = arith.constant 0 : index
    %c0_3 = arith.constant 0 : index
    %c0_4 = arith.constant 0 : index
    %1 = vector.load %arg3[%c0_2, %c0_3, %c0_4] : memref<1x4x1xf32, #tpu.memory_space<vmem>>, vector<1x4x1xf32>
    %c0_5 = arith.constant 0 : index
    %c0_6 = arith.constant 0 : index
    %c0_7 = arith.constant 0 : index
    %2 = vector.load %arg4[%c0_5, %c0_6, %c0_7] : memref<1x4x1xf32, #tpu.memory_space<vmem>>, vector<1x4x1xf32>
    %cst = arith.constant dense<0.000000e+00> : vector<1x256xf32>
    %3 = vector.multi_reduction <add>, %0, %cst [1] : vector<1x4x256xf32> to vector<1x256xf32>
    %4 = vector.shape_cast %3 : vector<1x256xf32> to vector<1x1x256xf32>
    %cst_8 = arith.constant 4.000000e+00 : f32
    %5 = vector.broadcast %cst_8 : f32 to vector<1x1x256xf32>
    %6 = arith.divf %4, %5 : vector<1x1x256xf32>
    %7 = vector.broadcast %6 : vector<1x1x256xf32> to vector<1x4x256xf32>
    %8 = arith.subf %0, %7 : vector<1x4x256xf32>
    %9 = arith.mulf %8, %8 : vector<1x4x256xf32>
    %cst_9 = arith.constant dense<0.000000e+00> : vector<1x256xf32>
    %10 = vector.multi_reduction <add>, %9, %cst_9 [1] : vector<1x4x256xf32> to vector<1x256xf32>
    %11 = vector.shape_cast %10 : vector<1x256xf32> to vector<1x1x256xf32>
    %cst_10 = arith.constant 4.000000e+00 : f32
    %12 = vector.broadcast %cst_10 : f32 to vector<1x1x256xf32>
    %13 = arith.divf %11, %12 : vector<1x1x256xf32>
    %cst_11 = arith.constant 9.99999974E-6 : f32
    %14 = vector.broadcast %cst_11 : f32 to vector<1x1x256xf32>
    %15 = arith.addf %13, %14 : vector<1x1x256xf32>
    %16 = math.rsqrt %15 : vector<1x1x256xf32>
    %17 = vector.broadcast %16 : vector<1x1x256xf32> to vector<1x4x256xf32>
    %18 = arith.mulf %8, %17 : vector<1x4x256xf32>
    %19 = vector.broadcast %1 : vector<1x4x1xf32> to vector<1x4x256xf32>
    %20 = arith.mulf %18, %19 : vector<1x4x256xf32>
    %21 = vector.broadcast %2 : vector<1x4x1xf32> to vector<1x4x256xf32>
    %22 = arith.addf %20, %21 : vector<1x4x256xf32>
    %c0_12 = arith.constant 0 : index
    %c0_13 = arith.constant 0 : index
    %c0_14 = arith.constant 0 : index
    %23 = vector.load %arg5[%c0_12, %c0_13, %c0_14] : memref<1x4x256xf32, #tpu.memory_space<vmem>>, vector<1x4x256xf32>
    tpu.vector_store %arg5[%c0_12, %c0_13, %c0_14], %22 {strides = array<i32>} : memref<1x4x256xf32, #tpu.memory_space<vmem>>, vector<1x4x256xf32>,
    return
  }
  func.func @transform_0(%arg0: i32, %arg1: i32) -> (i32, i32, i32) {
    %c0_i32 = arith.constant 0 : i32
    %c0_i32_0 = arith.constant 0 : i32
    return %arg0, %c0_i32, %arg1 : i32, i32, i32
  }
  func.func @transform_1(%arg0: i32, %arg1: i32) -> (i32, i32, i32) {
    %c0_i32 = arith.constant 0 : i32
    %c0_i32_0 = arith.constant 0 : i32
    %c0_i32_1 = arith.constant 0 : i32
    %c0_i32_2 = arith.constant 0 : i32
    return %c0_i32, %c0_i32_0, %c0_i32_1 : i32, i32, i32
  }
  func.func @transform_2(%arg0: i32, %arg1: i32) -> (i32, i32, i32) {
    %c0_i32 = arith.constant 0 : i32
    %c0_i32_0 = arith.constant 0 : i32
    %c0_i32_1 = arith.constant 0 : i32
    %c0_i32_2 = arith.constant 0 : i32
    return %c0_i32, %c0_i32_0, %c0_i32_1 : i32, i32, i32
  }
  func.func @transform_3(%arg0: i32, %arg1: i32) -> (i32, i32, i32) {
    %c0_i32 = arith.constant 0 : i32
    %c0_i32_0 = arith.constant 0 : i32
    return %arg0, %c0_i32, %arg1 : i32, i32, i32
  }
}

</mosaic_0001>

<bundles_post_ra>
// kernel: tpu_custom_call.1
= control target key start
LH: loop header
LB: loop body
LE: loop exit
PB: predicated region body
PF: predicated region fallthrough
CT: control target
= control target key end

     0   :  { %8 = vsyncpa [#allocation3], 0  ;;  %s762_s0 = inlined_call_operand.hbm [shape: f32[2,4,256], index: 0, kind: input, shape index: {}]   ;;  %s763_s1 = inlined_call_operand.vmem [shape: f32[1,4,1], index: 1, kind: input, shape index: {}]   ;;  %s764_s2 = inlined_call_operand.vmem [shape: f32[1,4,1], index: 2, kind: input, shape index: {}]   ;;  %s765_s3 = inlined_call_operand.hbm [shape: f32[2,4,256], index: 3, kind: output, shape index: {}]  }
   0x1   :  { %10 = vsyncpa [#allocation3 + $0x1], 0 }
   0x2   :  { %11 = vsyncpa [#allocation4], 0 }
   0x3   :  { %13 = vsyncpa [#allocation4 + $0x1], 0  ;;  %s614_s12 = smov 0   ;;  %s616_s13 = smov 0  }
   0x4   :  { %s618_s14 = smov 0   ;;  %s620_s15 = smov 0  }
   0x5   :  { %s622_s16 = smov 0   ;;  %s624_s17 = smov 0  }
   0x6 LB: > { %s393_s18 = sadd.s32 4294967295, %s588_s17   ;;  %s394_s19 = sadd.s32 4294967294, %s588_s17   ;;  %s588_s17 = sphi %s624_s17, %s19_s17   ;;  %s584_s16 = sphi %s622_s16, %s777_s16   ;;  %s580_s15 = sphi %s620_s15, %s776_s15   ;;  %s576_s14 = sphi %s618_s14, %s775_s14   ;;  %s572_s13 = sphi %s616_s13, %s774_s13   ;;  %s568_s12 = sphi %s614_s12, %s773_s12  }
   0x7   : > { %s31_s20 = sadd.s32 1, %s584_s16  ;;  %s40_s21 = sadd.s32 1, %s576_s14 }
   0x8   : > { %p33_p0 = scmp.ge.s32.totalorder %s31_s20, 2  ;;  %p47_p1 = scmp.ne.s32.totalorder %s576_s14, %s572_s13 }
   0x9   : > { %p48_p2 = scmp.eq.s32.totalorder %s588_s17, 0  ;;  %p53_p3 = scmp.ne.s32.totalorder %s572_s13, %s568_s12 }
   0xa   : > { %s779_s20 = smov (%p33_p0, %s31_s20), 0  ;;  %p54_p5 = scmp.eq.s32.totalorder %s393_s18, 0 }
   0xb   : > { %p655_p4 = por %p48_p2, %p47_p1  ;;  %s35_s23 = ssub.s32 %s584_s16, %s779_s20 }
   0xc   : > { %p121_p6 = scmp.eq.s32.totalorder %s393_s18, 1  ;;  %p38_p7 = scmp.eq.s32.totalorder %s35_s23, 0 }
   0xd   : > { %p661_p8 = por %p54_p5, %p53_p3  ;;  %p127_p10 = scmp.eq.s32.totalorder %s394_s19, 1 }
   0xe   : > { %p665_p9 = por %p121_p6, %p47_p1  ;;  %p422_p13 = scmp.lt.s32.totalorder %s588_s17, 2 }
   0xf   : > { %s670_s26 = scalar_select %p38_p7, %s576_s14, %s40_s21  }
  0x10   : > { %p672_p11 = por %p127_p10, %p53_p3  ;;  %s153_s28 = sand.u32 1, %s576_s14  }
  0x11   : > { %s397_s29 = sshll.u32 %s153_s28, 3  ;;  %s408_s30 = sshll.u32 %s584_s16, 7 }
  0x12   : > { %s769_s27 = scalar_select %p672_p11, 1, 0 }
  0x13   : > { %s165_s6 = scalar_lea.hbm %s762_s0, %s408_s30  ;;  %s157_s7 = scalar_lea.vmem [#allocation2], %s397_s29 }
  0x14   : > { %s167_s8 = sshll.u32 %s157_s7, 4  ;;  %p685_p0 = pnand %p422_p13, %p655_p4  ;;  %s168_s8 = int_to_ptr.vmem [resolvable:$true] %s167_s8 }
  0x15   : > { %p400_p1 = scmp.ge.s32.totalorder %s588_s17, 1  ;;  %p172_p2 = scmp.lt.s32.totalorder %s588_s17, 3 }
  0x16   : > { %s154_s10 = scalar_lea.sflag [#allocation3], %s153_s28  ;;  %p482_p3 = pneg %p685_p0 }
  0x17   : > { %s493_s11 = scalar_lea.vmem %s168_s8, 128  ;;  %s590_s18 = smov [#allocation2]  }
  0x18   : > { %p494_p5 = scmp.ne.s32.totalorder %s168_s8, %s493_s11  ;;  %s498_s19 = sshll.u32 %s590_s18, 4  ;;  %s499_s19 = int_to_ptr.vmem [resolvable:$false] %s498_s19 }
  0x19   : > { %s500_s21 = scalar_lea.vmem %s499_s19, 256  ;;  %p501_p10 = scmp.lt.s32.totalorder %s168_s8, %s499_s19 }
  0x1a   : > { %p496_p6 = pnand %p494_p5, %p482_p3  ;;  %p502_p12 = scmp.lt.s32.totalorder %s500_s21, %s493_s11 }
  0x1c   : > { %p497_p7 = pneg %p496_p6  ;;  %p503_p4 = por %p502_p12, %p501_p10 }
  0x1e   : > { %p504_p13 = pnand %p503_p4, %p497_p7 }
  0x20   : > { %507 = shalt.err (!%p504_p13)
}
  0x21   : > { %417 = dma.hbm_to_vmem [thread:$0]  (!%p685_p0), %s165_s6, 128, %s168_s8, %s154_s10  }
  0x22   : > { %p173_p11 = pnand %p400_p1, %p172_p2 }
  0x23   : > { %s700_s22 = sand.u32 (!%p173_p11), 1, %s572_s13  }
  0x24   : > { %176 = sbr.rel (%p173_p11) target bundleno = 189 (0xbd), region = 32  ;;  %s401_s23 = sshll.u32 (!%p173_p11), %s700_s22, 3 }
  0x25   : > { %s179_s28 = scalar_lea.sflag (!%p173_p11), [#allocation3], %s700_s22  ;;  %s182_s29 = scalar_lea.vmem (!%p173_p11), [#allocation2], %s401_s23 }
  0x29   : > { %559 = dma.done.wait (%p661_p8), %s179_s28, 128  }
  0x2a   : > { %561 = vsyncadd (%p661_p8), %s179_s28, 4294967168  ;;  %v591_v0 = vmov 0   ;;  %v208_v1 = vld [vmem:[%s763_s1] sm:$0xf]  ;;  %vm213_vm0 = vcmask 1043456   ;;  %v272_v45 = vlaneseq  ;;  %s409_s24 = sshll.u32 %s580_s15, 7 }
  0x2b   : > { %474 = vset.pattern.permute.xlu0 %v591_v0  ;;  %v209_v2 = vld [vmem:[%s764_s2] sm:$0xf]  ;;  %v592_v43 = vmov 839922192   ;;  %s204_s7 = scalar_lea.vmem [#allocation5], %s401_s23  ;;  %s307_s11 = scalar_lea.hbm %s765_s3, %s409_s24 }
  0x2c   : > { %267 = vperm.xlu0 %474, %v208_v1   ;;  %v207_v3 = vld [vmem:[%s182_s29] sm:$0xff]  ;;  %v270_v44 = vunpack.c.l.s4 %v592_v43  ;;  %v273_v48 = vshrl.u32 %v272_v45, 7  ;;  %s309_s8 = sshll.u32 %s204_s7, 4  ;;  %s293_s18 = scalar_lea.sflag [#allocation4], %s700_s22  ;;  %s310_s8 = int_to_ptr.vmem [resolvable:$true] %s309_s8 }
  0x2d   : > { %v211_v4 = vcombine.high %v207_v3, %v207_v3  ;;  %v214_v5 = vsel %vm213_vm0, %v207_v3, 0.0  ;;  %s508_s19 = scalar_lea.vmem %s310_s8, 128  ;;  %s593_s21 = smov [#allocation5]  }
  0x2e   : > { %v215_v7 = vrot.slane %v214_v5, 4  ;;  %v271_v47 = vunpack.c.0.s8 %v270_v44  ;;  %p509_p8 = scmp.ne.s32.totalorder %s310_s8, %s508_s19  ;;  %s512_s15 = sshll.u32 %s593_s21, 4  ;;  %s513_s15 = int_to_ptr.vmem [resolvable:$false] %s512_s15 }
  0x2f   : > { %v221_v6 = vsel %vm213_vm0, %v211_v4, 0.0  ;;  %s514_s23 = scalar_lea.vmem %s513_s15, 256  ;;  %p515_p0 = scmp.lt.s32.totalorder %s310_s8, %s513_s15 }
  0x30   : > { %280 = vperm.xlu0 %474, %v209_v2   ;;  %v222_v8 = vrot.slane %v221_v6, 4  ;;  %v216_v9 = vadd.f32 %v215_v7, %v214_v5  ;;  %v274_v50 = vsub.s32 %v271_v47, %v273_v48  ;;  %p510_p11 = pnand %p509_p8, %p665_p9  ;;  %p516_p1 = scmp.lt.s32.totalorder %s514_s23, %s508_s19 }
  0x32   : > { %v223_v10 = vadd.f32 %v222_v8, %v221_v6  ;;  %v217_v11 = vrot.slane %v216_v9, 2  ;;  %p511_p12 = pneg %p510_p11  ;;  %p517_p2 = por %p516_p1, %p515_p0 }
  0x34   : > { %v224_v12 = vrot.slane %v223_v10, 2  ;;  %v218_v13 = vadd.f32 %v217_v11, %v216_v9  ;;  %p518_p3 = pnand %p517_p2, %p511_p12 }
  0x36   : > { %v225_v14 = vadd.f32 %v224_v12, %v223_v10  ;;  %v219_v15 = vrot.slane %v218_v13, 1 }
  0x38   : > { %v226_v16 = vrot.slane %v225_v14, 1  ;;  %v220_v17 = vadd.f32 %v219_v15, %v218_v13 }
  0x3a   : > { %v227_v18 = vadd.f32 %v226_v16, %v225_v14  ;;  %v229_v19 = vmul.f32 0.25, %v220_v17 }
  0x3c   : > { %v230_v20 = vmul.f32 0.25, %v227_v18 }
  0x3e   : > { %v233_v21 = vcombine.low %v229_v19, %v230_v20 }
  0x40   : > { %v235_v22 = vsub.f32 %v207_v3, %v233_v21 }
  0x42   : > { %v236_v23 = vmul.f32 %v235_v22, %v235_v22 }
  0x44   : > { %v238_v24 = vcombine.high %v236_v23, %v236_v23  ;;  %v240_v25 = vsel %vm213_vm0, %v236_v23, 0.0 }
  0x45   : > { %v241_v27 = vrot.slane %v240_v25, 4 }
  0x46   : > { %v247_v26 = vsel %vm213_vm0, %v238_v24, 0.0 }
  0x47   : > { %v248_v28 = vrot.slane %v247_v26, 4  ;;  %v242_v29 = vadd.f32 %v241_v27, %v240_v25 }
  0x49   : > { %v249_v30 = vadd.f32 %v248_v28, %v247_v26  ;;  %v243_v31 = vrot.slane %v242_v29, 2 }
  0x4b   : > { %v250_v32 = vrot.slane %v249_v30, 2  ;;  %v244_v33 = vadd.f32 %v243_v31, %v242_v29 }
  0x4d   : > { %v251_v34 = vadd.f32 %v250_v32, %v249_v30  ;;  %v245_v35 = vrot.slane %v244_v33, 1 }
  0x4f   : > { %v252_v36 = vrot.slane %v251_v34, 1  ;;  %v246_v37 = vadd.f32 %v245_v35, %v244_v33 }
  0x51   : > { %v253_v38 = vadd.f32 %v252_v36, %v251_v34  ;;  %v254_v39 = vmul.f32 0.25, %v246_v37 }
  0x53   : > { %v255_v40 = vmul.f32 0.25, %v253_v38  ;;  %v256_v41 = vadd.f32 1e-05, %v254_v39 }
  0x55   : > { %v257_v42 = vadd.f32 1e-05, %v255_v40  ;;  %476 = vrsqrt.f32 %v256_v41 }
  0x57   : > { %478 = vrsqrt.f32 %v257_v42 }
  0x62   : > { %v477_v46 = vpop.eup %476 }
  0x64   : > { %v479_v49 = vpop.eup %478 }
  0x65   : > { %v262_v51 = vcombine.low %v477_v46, %v479_v49 }
  0x67   : > { %v264_v53 = vmul.f32 %v262_v51, %v235_v22 }
  0xa7   : > { %v268_v52 = vpop.permute.xlu0 %267 }
  0xa8   : > { %v275_v54 = vrot.slane %v268_v52, %v274_v50 }
  0xaa   : > { %v277_v56 = vmul.f32 %v275_v54, %v264_v53 }
  0xab   : > { %v281_v55 = vpop.permute.xlu0 %280 }
  0xac   : > { %v288_v57 = vrot.slane %v281_v55, %v274_v50 }
  0xae   : > { %v290_v58 = vadd.f32 %v288_v57, %v277_v56 }
  0xb0   : > { %291 = vst [vmem:[%s204_s7] sm:$0xff] %v290_v58 }
  0xb1   : > { %521 = shalt.err (!%p518_p3)
}
  0xb2   : > { %s522_s28 = scalar_lea.hbm %s307_s11, 128  ;;  %s526_s30 = scalar_lea.hbm %s765_s3, 256 }
  0xb3   : > { %p523_p5 = scmp.ne.s32.totalorder %s307_s11, %s522_s28  ;;  %p527_p10 = scmp.lt.s32.totalorder %s307_s11, %s765_s3 }
  0xb4   : > { %p528_p4 = scmp.lt.s32.totalorder %s526_s30, %s522_s28 }
  0xb5   : > { %p524_p6 = pnand %p523_p5, %p665_p9 }
  0xb6   : > { %p529_p13 = por %p528_p4, %p527_p10 }
  0xb7   : > { %p525_p7 = pneg %p524_p6 }
  0xb9   : > { %p530_p8 = pnand %p529_p13, %p525_p7 }
  0xbb   : > { %533 = shalt.err (!%p530_p8)
}
  0xbc   : > { %412 = dma.vmem_to_hbm [thread:$0]  (%p665_p9), %s310_s8, 128, %s307_s11, %s293_s18  }
  0xbd PF: > { %s321_s6 = sand.u32 1, %s568_s12   ;;  %p771_p11 = scmp.ne.s32.totalorder %s769_s27, 0 }
  0xbe   : > { %p772_p12 = scmp.ge.s32.totalorder %s588_s17, 2  ;;  %s322_s24 = scalar_lea.sflag [#allocation4], %s321_s6 }
  0xc0   : > { %p419_p0 = pnand %p772_p12, %p771_p11 }
  0xc2   : > { %p420_p1 = pneg %p419_p0 }
  0xc4   : > { %563 = dma.done.wait (%p420_p1), %s322_s24, 128  }
  0xc5   : > { %565 = vsyncadd (%p420_p1), %s322_s24, 4294967168  ;;  %s19_s17 = sadd.s32 1, %s588_s17   ;;  %s773_s12 = smov %s572_s13 }
  0xc6   : > { %p16_p2 = scmp.ge.s32.totalorder %s19_s17, 4   ;;  %s774_s13 = smov %s576_s14 }
  0xc7   : > { %s775_s14 = smov %s670_s26  ;;  %s776_s15 = smov %s584_s16 }
  0xc8   : > { %s777_s16 = smov %s779_s20  ;;  %18 = sbr.rel (!%p16_p2) target bundleno = 6 (0x6), region = 77 }
  0xcd   :  { %327 = vsyncpa [#allocation3], 1 }
  0xce   :  { %329 = vsyncpa [#allocation3 + $0x1], 1 }
  0xcf   :  { %330 = vsyncpa [#allocation4], 1 }
  0xd0   :  { %332 = vsyncpa [#allocation4 + $0x1], 1 }

</bundles_post_ra>
